<compile_context>
chip_gen: v7x
topology: tpu7x:2x2x1
jax: 0.10.0
libtpu: 0.0.40
codegen_flags: <defaults>
</compile_context>

<pallas_src>
import functools
import math

import jax
import jax.numpy as jnp
from jax.experimental import pallas as pl
from jax.experimental.pallas import tpu as pltpu

EPS = 1e-5
BIG = 1e30
N_AGG = 4          # mean, max, min, std
N_SCALERS = 3      # identity, amplification, attenuation


def _round_up(x, m):
    return (x + m - 1) // m * m


# ----------------------------------------------------------------------------
# Kernel 1: dense Linear (y = x @ W + b), used for embedding_h.
# Runs as one (or very few) grid steps — the GEMM is tiny.
# ----------------------------------------------------------------------------
def _linear_kernel(x_ref, w_ref, b_ref, o_ref):
    y = jnp.dot(x_ref[...], w_ref[...], preferred_element_type=jnp.float32)
    o_ref[...] = (y + b_ref[...]).astype(o_ref.dtype)


def linear(x, w, b, *, tm=2048):
    N, Din = x.shape
    Dout = w.shape[1]
    tm = min(tm, N)
    while N % tm:          # N is always a multiple of 128 here
        tm //= 2
    return pl.pallas_call(
        _linear_kernel,
        out_shape=jax.ShapeDtypeStruct((N, Dout), jnp.float32),
        grid=(N // tm,),
        in_specs=[
            pl.BlockSpec((tm, Din), lambda i: (i, 0)),
            pl.BlockSpec((Din, Dout), lambda i: (0, 0)),
            pl.BlockSpec((1, Dout), lambda i: (0, 0)),
        ],
        out_specs=pl.BlockSpec((tm, Dout), lambda i: (i, 0)),
        compiler_params=pltpu.CompilerParams(dimension_semantics=("parallel",)),
    )(x, w, b)


# ----------------------------------------------------------------------------
# Kernel 2: fused EIG layer.
# Grid = (node tiles, neighbour-chunk tiles).  Per K step: one bf16 MXU matmul
# A @ [H | H^2 | 1 | pad] (sum, sum-of-squares, degree), plus lane-dense
# mask-select running max/min.  On the last K step: finalize mean/std/scalers,
# apply the (BN-folded) posttrans linear, graph_norm, shift, ReLU, residual.
# ----------------------------------------------------------------------------
def _eig_layer_kernel(a_ref, hcat_ref, ht_ref, hin_ref, snorm_ref,
                      wh_ref, wa_ref, b_ref, shift_ref,
                      o_ref,
                      acc_ref, max_ref, min_ref,
                      *, d, dout, ch, avg_d_log, graph_norm, residual):
    k = pl.program_id(1)
    nk = pl.num_programs(1)

    @pl.when(k == 0)
    def _init():
        acc_ref[...] = jnp.zeros(acc_ref.shape, acc_ref.dtype)
        max_ref[...] = jnp.full(max_ref.shape, -BIG, max_ref.dtype)
        min_ref[...] = jnp.full(min_ref.shape, BIG, min_ref.dtype)

    a = a_ref[...]                               # (tm, tk) bf16 in {0, 1}

    # sum, sum-of-squares AND degree in a single bf16 MXU matmul (f32 acc).
    acc_ref[...] += jnp.dot(a, hcat_ref[...], preferred_element_type=jnp.float32)

    # masked max / min over this neighbour chunk — lane-dense (tk on lanes),
    # single boolean select per reduction, f32 compare/select path.
    mask = a > 0                                  # (tm, tk)
    m3 = mask[:, None, :]                         # (tm, 1, tk)
    ht = ht_ref[...]                              # (d, tk) f32, exact H^T
    for c0 in range(0, d, ch):                    # channel chunks bound temps
        c1 = min(c0 + ch, d)
        hc = ht[c0:c1, :][None, :, :]             # (1, cc, tk)
        mx = jnp.max(jnp.where(m3, hc, -BIG), axis=2)          # (tm, cc)
        mn = jnp.min(jnp.where(m3, hc, BIG), axis=2)
        max_ref[:, c0:c1] = jnp.maximum(max_ref[:, c0:c1], mx)
        min_ref[:, c0:c1] = jnp.minimum(min_ref[:, c0:c1], mn)

    @pl.when(k == nk - 1)
    def _finalize():
        acc = acc_ref[...]
        deg = acc[:, 2 * d:2 * d + 1]             # (tm, 1), exact integer
        deg_safe = jnp.maximum(deg, 1.0)
        inv = 1.0 / deg_safe
        s1 = acc[:, :d]
        s2 = acc[:, d:2 * d]
        mean = s1 * inv
        var = jnp.maximum(s2 * inv - mean * mean, 0.0)
        std = jnp.sqrt(var + EPS)
        has_nb = deg > 0.5
        maxv = jnp.where(has_nb, max_ref[...], 0.0)
        minv = jnp.where(has_nb, min_ref[...], 0.0)
        aggs = jnp.concatenate([mean, maxv, minv, std], axis=1)   # (tm, 4d)

        # degree scalers, applied AFTER the matmul (row scaling commutes).
        logd = jnp.log(deg + 1.0)
        amp = logd * (1.0 / avg_d_log)
        att = jnp.where(has_nb, avg_d_log / jnp.maximum(logd, EPS), 0.0)

        h_in = hin_ref[...]
        # single (tm,4d)@(4d,3*dout) matmul for all three scaler blocks
        z = jnp.dot(aggs, wa_ref[...], preferred_element_type=jnp.float32)
        y = (jnp.dot(h_in, wh_ref[...], preferred_element_type=jnp.float32)
             + z[:, :dout] + amp * z[:, dout:2 * dout] + att * z[:, 2 * dout:]
             + b_ref[...])
        if graph_norm:
            y = y * snorm_ref[...]
        y = y + shift_ref[...]                    # folded BatchNorm shift
        y = jnp.maximum(y, 0.0)
        if residual:
            y = h_in + y
        o_ref[...] = y.astype(o_ref.dtype)


def eig_layer(A_bf16, h, snorm_n, lp, *, avg_d_log, graph_norm, batch_norm,
              residual, tm=128, tk=128):
    Np, D = h.shape
    Dout = lp["w_h"].shape[1]
    tm = min(tm, Np)
    tk = min(tk, Np)
    while Np % tm:
        tm //= 2
    while Np % tk:
        tk //= 2
    # v7x megacore: keep an even number of node tiles so both TCs stay busy.
    if (Np // tm) % 2 == 1 and tm % 16 == 0:
        tm //= 2
    assert Np % tm == 0 and Np % tk == 0
    residual = residual and (D == Dout)   # matches EIGLayer (no residual if dims differ)

    # Fold eval-mode BatchNorm (gamma * rsqrt(rvar+eps)) into weights / bias.
    if batch_norm:
        sg = lp["gamma"] * jax.lax.rsqrt(lp["rvar"] + EPS)        # (1, Dout)
        shift = lp["beta"] - lp["rmean"] * sg
    else:
        sg = jnp.ones((1, Dout), jnp.float32)
        shift = jnp.zeros((1, Dout), jnp.float32)
    w_h = lp["w_h"] * sg
    b = lp["b"] * sg
    wa = lp["w_agg"] * sg                                          # (12D, Dout)
    # stack the three scaler blocks along the output dim -> one finalize matmul
    wa_cat = jnp.concatenate([wa[:4 * D], wa[4 * D:8 * D], wa[8 * D:]], axis=1)

    # [H | H^2 | 1 | 0-pad] in bf16, lane-padded to a multiple of 128 so the
    # per-step matmul also produces the degree and the accumulator is vreg-wide.
    Wc = _round_up(2 * D + 1, 128)
    hcat = jnp.concatenate(
        [h, h * h, jnp.ones((Np, 1), jnp.float32),
         jnp.zeros((Np, Wc - 2 * D - 1), jnp.float32)], axis=1).astype(jnp.bfloat16)
    hT = jnp.transpose(h)                                          # (D, Np) f32

    # channel chunk so the (tm, ch, tk) f32 broadcast temp stays ~<= 8 MiB
    ch = min(D, max(8, (8 << 20) // (tm * tk * 4)))
    ch = max(8, ch - ch % 8)

    kernel = functools.partial(_eig_layer_kernel, d=D, dout=Dout, ch=ch,
                               avg_d_log=avg_d_log, graph_norm=graph_norm,
                               residual=residual)
    return pl.pallas_call(
        kernel,
        out_shape=jax.ShapeDtypeStruct((Np, Dout), jnp.float32),
        grid=(Np // tm, Np // tk),
        in_specs=[
            pl.BlockSpec((tm, tk), lambda i, k: (i, k)),           # A (bf16)
            pl.BlockSpec((tk, Wc), lambda i, k: (k, 0)),           # [H|H^2|1|0] bf16
            pl.BlockSpec((D, tk), lambda i, k: (0, k)),            # H^T f32 (max/min)
            pl.BlockSpec((tm, D), lambda i, k: (i, 0)),            # h rows f32
            pl.BlockSpec((tm, 1), lambda i, k: (i, 0)),            # snorm_n
            pl.BlockSpec((D, Dout), lambda i, k: (0, 0)),          # w_h (BN-folded)
            pl.BlockSpec((4 * D, 3 * Dout), lambda i, k: (0, 0)),  # w_agg stacked
            pl.BlockSpec((1, Dout), lambda i, k: (0, 0)),          # bias (BN-folded)
            pl.BlockSpec((1, Dout), lambda i, k: (0, 0)),          # BN shift
        ],
        out_specs=pl.BlockSpec((tm, Dout), lambda i, k: (i, 0)),
        scratch_shapes=[
            pltpu.VMEM((tm, Wc), jnp.float32),   # sum / sum-of-squares / degree
            pltpu.VMEM((tm, D), jnp.float32),    # running max
            pltpu.VMEM((tm, D), jnp.float32),    # running min
        ],
        compiler_params=pltpu.CompilerParams(
            dimension_semantics=("parallel", "arbitrary"),
            vmem_limit_bytes=32 * 1024 * 1024),
    )(A_bf16, hcat, hT, h, snorm_n, w_h, wa_cat, b, shift)


# ----------------------------------------------------------------------------
# EIGNet forward (wrapper / glue)
# ----------------------------------------------------------------------------
def eig_net_forward(A, h, e, snorm_n, snorm_e, params, cfg, *, tm=128, tk=128):
    del e, snorm_e  # unused: edge_feat=False, type_net='simple'
    N = h.shape[0]
    Np = _round_up(N, 128)           # pad only to 128 (minimal O(N^2) waste)
    pad_n = Np - N
    if pad_n:
        A = jnp.pad(A, ((0, pad_n), (0, pad_n)))
        h = jnp.pad(h, ((0, pad_n), (0, 0)))
        snorm_n = jnp.pad(snorm_n, ((0, pad_n), (0, 0)))
    A_bf = A.astype(jnp.bfloat16)    # exact for {0,1}; halves DMA vs f32
    # (further option: int8 adjacency in HBM + in-kernel bf16 upcast once
    #  large graphs become DMA-bound)

    h = linear(h, params["emb_w"], params["emb_b"])      # embedding_h
    # in_feat_dropout: eval mode -> identity
    for lp in params["layers"]:
        h = eig_layer(A_bf, h, snorm_n, lp,
                      avg_d_log=cfg["avg_d_log"],
                      graph_norm=cfg["graph_norm"],
                      batch_norm=cfg["batch_norm"],
                      residual=cfg["residual"],
                      tm=tm, tk=tk)
        # gru_enable=False -> no GRU
    return h[:N]


# ----------------------------------------------------------------------------
# Pure-JAX reference (unfused, unfolded BN) for sanity checking
# ----------------------------------------------------------------------------
def reference_forward(A, h, snorm_n, params, cfg):
    h = h @ params["emb_w"] + params["emb_b"]
    avg_d_log = cfg["avg_d_log"]
    for lp in params["layers"]:
        deg = A.sum(1, keepdims=True)
        degs = jnp.maximum(deg, 1.0)
        mean = (A @ h) / degs
        var = jnp.maximum((A @ (h * h)) / degs - mean * mean, 0.0)
        std = jnp.sqrt(var + EPS)
        mask = A[:, :, None] > 0.5
        hb = h[None, :, :]
        hasn = deg > 0.5
        maxv = jnp.where(hasn, jnp.max(jnp.where(mask, hb, -BIG), 1), 0.0)
        minv = jnp.where(hasn, jnp.min(jnp.where(mask, hb, BIG), 1), 0.0)
        aggs = jnp.concatenate([mean, maxv, minv, std], 1)
        logd = jnp.log(deg + 1.0)
        amp = logd / avg_d_log
        att = jnp.where(deg > 0.5, avg_d_log / jnp.maximum(logd, EPS), 0.0)
        agg = jnp.concatenate([aggs, aggs * amp, aggs * att], 1)
        y = h @ lp["w_h"] + agg @ lp["w_agg"] + lp["b"]
        if cfg["graph_norm"]:
            y = y * snorm_n
        if cfg["batch_norm"]:
            y = ((y - lp["rmean"]) * jax.lax.rsqrt(lp["rvar"] + EPS)
                 * lp["gamma"] + lp["beta"])
        y = jnp.maximum(y, 0.0)
        if cfg["residual"]:
            y = h + y
        h = y
    return h


# ----------------------------------------------------------------------------
# Deterministic parameter init (shapes implied by the module's __init__)
# ----------------------------------------------------------------------------
def init_params(key, in_dim, hidden_dim, out_dim, n_layers):
    ks = jax.random.split(key, 6 * n_layers + 1)

    def lin_w(k, din, dout):
        return (jax.random.normal(k, (din, dout), jnp.float32)
                * (1.0 / jnp.sqrt(float(din))))

    params = {
        "emb_w": lin_w(ks[0], in_dim, hidden_dim),
        "emb_b": jnp.zeros((1, hidden_dim), jnp.float32),
        "layers": [],
    }
    dims = [hidden_dim] * (n_layers - 1) + [out_dim]
    d_in = hidden_dim
    for li, d_out in enumerate(dims):
        d_agg = N_SCALERS * N_AGG * d_in
        k0, k1, k2, k3, k4, k5 = ks[1 + 6 * li:1 + 6 * (li + 1)]
        layer = dict(
            w_h=lin_w(k0, d_in, d_out),
            w_agg=lin_w(k1, d_agg, d_out),
            b=0.05 * jax.random.normal(k2, (1, d_out), jnp.float32),
            # non-trivial eval-mode BN stats so the folding path is exercised
            gamma=1.0 + 0.2 * jax.random.normal(k3, (1, d_out), jnp.float32),
            beta=0.1 * jax.random.normal(k4, (1, d_out), jnp.float32),
            rmean=0.1 * jax.random.normal(k5, (1, d_out), jnp.float32),
            rvar=jnp.full((1, d_out), 0.8, jnp.float32),
        )
        params["layers"].append(layer)
        d_in = d_out
    return params


if __name__ == "__main__":
    key = jax.random.PRNGKey(0)
    # N deliberately not a multiple of 128 to exercise padding/tail handling.
    N, in_dim, hidden_dim, out_dim, n_layers = 300, 16, 32, 32, 2
    k_adj, k_h, k_e, k_p = jax.random.split(key, 4)

    # synthetic undirected graph (dense adjacency, no self loops)
    u = jax.random.uniform(k_adj, (N, N))
    A = (u < 0.03).astype(jnp.float32)
    A = jnp.maximum(A, A.T)
    A = A * (1.0 - jnp.eye(N, dtype=jnp.float32))

    deg = A.sum(axis=1)
    avg_d_log = float(jnp.mean(jnp.log(deg + 1.0)))   # PNA-style avg_d['log']

    h = jax.random.normal(k_h, (N, in_dim), jnp.float32)
    n_edges = int(A.sum())
    e = jax.random.normal(k_e, (max(n_edges, 1), 1), jnp.float32)   # unused
    snorm_n = jnp.full((N, 1), 1.0 / jnp.sqrt(float(N)), jnp.float32)
    snorm_e = jnp.ones((max(n_edges, 1), 1), jnp.float32)           # unused

    cfg = dict(graph_norm=True, batch_norm=True, residual=True,
               avg_d_log=avg_d_log)
    params = init_params(k_p, in_dim, hidden_dim, out_dim, n_layers)

    out = eig_net_forward(A, h, e, snorm_n, snorm_e, params, cfg)
    out = jax.block_until_ready(out)

    ref = reference_forward(A, h, snorm_n, params, cfg)
    assert out.shape == (N, out_dim)
    assert bool(jnp.allclose(out, ref, rtol=1e-3, atol=1e-3)), (
        float(jnp.max(jnp.abs(out - ref))))

    print("KERNEL_OK")
</pallas_src>

<mosaic_0001>
module attributes {stable_mosaic.version = 11 : i64} {
  func.func @_linear_kernel(%arg0: i32, %arg1: memref<384x16xf32, #tpu.memory_space<vmem>>, %arg2: memref<16x32xf32, #tpu.memory_space<vmem>>, %arg3: memref<1x32xf32, #tpu.memory_space<vmem>>, %arg4: memref<384x32xf32, #tpu.memory_space<vmem>>) attributes {dimension_semantics = [#tpu.dimension_semantics<parallel>], iteration_bounds = array<i64: 1>, scalar_prefetch = 0 : i64, scratch_operands = 0 : i64, tpu.core_type = #tpu.core_type<tc>, window_params = [{transform_indices = @transform_0, window_bounds = array<i64: 384, 16>}, {pipeline_mode = #tpu.pipeline_mode<synchronous>, transform_indices = @transform_1, window_bounds = array<i64: 16, 32>}, {pipeline_mode = #tpu.pipeline_mode<synchronous>, transform_indices = @transform_2, window_bounds = array<i64: 1, 32>}, {transform_indices = @transform_3, window_bounds = array<i64: 384, 32>}]} {
    %c0 = arith.constant 0 : index
    %c0_0 = arith.constant 0 : index
    %0 = vector.load %arg1[%c0, %c0_0] : memref<384x16xf32, #tpu.memory_space<vmem>>, vector<384x16xf32>
    %c0_1 = arith.constant 0 : index
    %c0_2 = arith.constant 0 : index
    %1 = vector.load %arg2[%c0_1, %c0_2] : memref<16x32xf32, #tpu.memory_space<vmem>>, vector<16x32xf32>
    %cst = arith.constant dense<0.000000e+00> : vector<384x32xf32>
    %2 = tpu.matmul %0, %1, %cst {dimension_numbers = #tpu.dot_dimension_numbers<[1], [0], [0], [1], [0, 0, 1, 1], [], []>} : vector<384x16xf32>, vector<16x32xf32>, vector<384x32xf32> -> vector<384x32xf32>
    %c0_3 = arith.constant 0 : index
    %c0_4 = arith.constant 0 : index
    %3 = vector.load %arg3[%c0_3, %c0_4] : memref<1x32xf32, #tpu.memory_space<vmem>>, vector<1x32xf32>
    %4 = vector.broadcast %3 : vector<1x32xf32> to vector<384x32xf32>
    %5 = arith.addf %2, %4 : vector<384x32xf32>
    %c0_5 = arith.constant 0 : index
    %c0_6 = arith.constant 0 : index
    %6 = vector.load %arg4[%c0_5, %c0_6] : memref<384x32xf32, #tpu.memory_space<vmem>>, vector<384x32xf32>
    tpu.vector_store %arg4[%c0_5, %c0_6], %5 {strides = array<i32>} : memref<384x32xf32, #tpu.memory_space<vmem>>, vector<384x32xf32>,
    return
  }
  func.func @transform_0(%arg0: i32) -> (i32, i32) {
    %c0_i32 = arith.constant 0 : i32
    %c0_i32_0 = arith.constant 0 : i32
    return %arg0, %c0_i32 : i32, i32
  }
  func.func @transform_1(%arg0: i32) -> (i32, i32) {
    %c0_i32 = arith.constant 0 : i32
    %c0_i32_0 = arith.constant 0 : i32
    %c0_i32_1 = arith.constant 0 : i32
    return %c0_i32, %c0_i32_0 : i32, i32
  }
  func.func @transform_2(%arg0: i32) -> (i32, i32) {
    %c0_i32 = arith.constant 0 : i32
    %c0_i32_0 = arith.constant 0 : i32
    %c0_i32_1 = arith.constant 0 : i32
    return %c0_i32, %c0_i32_0 : i32, i32
  }
  func.func @transform_3(%arg0: i32) -> (i32, i32) {
    %c0_i32 = arith.constant 0 : i32
    %c0_i32_0 = arith.constant 0 : i32
    return %arg0, %c0_i32 : i32, i32
  }
}

</mosaic_0001>

<bundles_post_ra>
// kernel: tpu_custom_call.1
= control target key start
LH: loop header
LB: loop body
LE: loop exit
PB: predicated region body
PF: predicated region fallthrough
CT: control target
= control target key end

     0   :  { %vm71_vm0 = vcmask 130048   ;;  %vm521_vm1 = vcmask 261120   ;;  %s1218_s1 = inlined_call_operand.vmem [shape: f32[16,32], index: 1, kind: input, shape index: {}]   ;;  %s1219_s0 = inlined_call_operand.vmem [shape: f32[384,16], index: 0, kind: input, shape index: {}]   ;;  %s1220_s2 = inlined_call_operand.vmem [shape: f32[1,32], index: 2, kind: input, shape index: {}]   ;;  %s1221_s3 = inlined_call_operand.vmem [shape: f32[384,32], index: 3, kind: output, shape index: {}]  }
   0x1   :  { %v62_v0 = vld [vmem:[%s1218_s1] sm:$0xff]  ;;  %v63_v1 = vld [vmem:[%s1218_s1 + $0x8] sm:$0xff]  ;;  %v16_v7 = vld [vmem:[%s1219_s0 + $0x10] sm:$0xff] }
   0x2   :  { %v14_v2 = vld [vmem:[%s1219_s0] sm:$0xff]  ;;  %v749_v3 = vpack.c.bf16 %v63_v1, %v62_v0  ;;  %v15_v5 = vld [vmem:[%s1219_s0 + $0x8] sm:$0xff]  ;;  %v40_v8 = vld [vmem:[%s1219_s0 + $0xd0] sm:$0xff] }
   0x3   :  { %677 = vmatprep.mubr.msk.f32.mxu0 %vm71_vm0, %v14_v2  ;;  %v38_v4 = vld [vmem:[%s1219_s0 + $0xc0] sm:$0xff]  ;;  %v39_v6 = vld [vmem:[%s1219_s0 + $0xc8] sm:$0xff]  ;;  %v17_v9 = vld [vmem:[%s1219_s0 + $0x18] sm:$0xff] }
   0x4   :  { %713 = vmatprep.mubr.msk.f32.mxu1 %vm71_vm0, %v38_v4  ;;  %750 = vmatprep.subr.bf16.mxu0 %v749_v3  ;;  %v41_v10 = vld [vmem:[%s1219_s0 + $0xd8] sm:$0xff]  ;;  %v18_v11 = vld [vmem:[%s1219_s0 + $0x20] sm:$0xff]  ;;  %v19_v13 = vld [vmem:[%s1219_s0 + $0x28] sm:$0xff] }
   0x5   :  { %753 = vmatprep.subr.bf16.mxu1 %v749_v3  ;;  %752 = vmatpush3.bf16.msra.mxu0 %v749_v3  ;;  %v42_v12 = vld [vmem:[%s1219_s0 + $0xe0] sm:$0xff]  ;;  %v43_v14 = vld [vmem:[%s1219_s0 + $0xe8] sm:$0xff]  ;;  %v20_v15 = vld [vmem:[%s1219_s0 + $0x30] sm:$0xff] }
   0x6   :  { %754 = vmatpush3.bf16.msra.mxu1 %v749_v3  ;;  %v44_v16 = vld [vmem:[%s1219_s0 + $0xf0] sm:$0xff]  ;;  %v21_v17 = vld [vmem:[%s1219_s0 + $0x38] sm:$0xff]  ;;  %v22_v19 = vld [vmem:[%s1219_s0 + $0x40] sm:$0xff] }
   0x7   :  { %v45_v18 = vld [vmem:[%s1219_s0 + $0xf8] sm:$0xff]  ;;  %v46_v20 = vld [vmem:[%s1219_s0 + $0x100] sm:$0xff]  ;;  %v23_v21 = vld [vmem:[%s1219_s0 + $0x48] sm:$0xff] }
   0x8   :  { %678 = vmatmul.mubr.msk.f32.vlgmr.msra.gmra.mrb[0].mxu0 %vm71_vm0, %v15_v5  ;;  %v47_v22 = vld [vmem:[%s1219_s0 + $0x108] sm:$0xff]  ;;  %v24_v23 = vld [vmem:[%s1219_s0 + $0x50] sm:$0xff]  ;;  %v25_v25 = vld [vmem:[%s1219_s0 + $0x58] sm:$0xff] }
   0x9   :  { %714 = vmatmul.mubr.msk.f32.vlgmr.msra.gmra.mrb[0].mxu1 %vm71_vm0, %v39_v6  ;;  %680 = vmatprep.mubr.msk.f32.mxu0 %vm71_vm0, %v16_v7  ;;  %v48_v24 = vld [vmem:[%s1219_s0 + $0x110] sm:$0xff]  ;;  %v49_v26 = vld [vmem:[%s1219_s0 + $0x118] sm:$0xff]  ;;  %v26_v27 = vld [vmem:[%s1219_s0 + $0x60] sm:$0xff] }
   0xa   :  { %716 = vmatprep.mubr.msk.f32.mxu1 %vm71_vm0, %v40_v8  ;;  %v50_v28 = vld [vmem:[%s1219_s0 + $0x120] sm:$0xff]  ;;  %v27_v29 = vld [vmem:[%s1219_s0 + $0x68] sm:$0xff]  ;;  %v28_v31 = vld [vmem:[%s1219_s0 + $0x70] sm:$0xff] }
   0xb   :  { %v51_v30 = vld [vmem:[%s1219_s0 + $0x128] sm:$0xff]  ;;  %v52_v32 = vld [vmem:[%s1219_s0 + $0x130] sm:$0xff]  ;;  %v29_v33 = vld [vmem:[%s1219_s0 + $0x78] sm:$0xff] }
   0xc   :  { %681 = vmatmul.mubr.msk.f32.gmra.mrb[2].mxu0 %vm71_vm0, %v17_v9  ;;  %v53_v34 = vld [vmem:[%s1219_s0 + $0x138] sm:$0xff]  ;;  %v30_v35 = vld [vmem:[%s1219_s0 + $0x80] sm:$0xff]  ;;  %v31_v37 = vld [vmem:[%s1219_s0 + $0x88] sm:$0xff] }
   0xd   :  { %717 = vmatmul.mubr.msk.f32.gmra.mrb[2].mxu1 %vm71_vm0, %v41_v10  ;;  %683 = vmatprep.mubr.msk.f32.mxu0 %vm71_vm0, %v18_v11  ;;  %v54_v36 = vld [vmem:[%s1219_s0 + $0x140] sm:$0xff]  ;;  %v55_v38 = vld [vmem:[%s1219_s0 + $0x148] sm:$0xff]  ;;  %v32_v39 = vld [vmem:[%s1219_s0 + $0x90] sm:$0xff] }
   0xe   :  { %719 = vmatprep.mubr.msk.f32.mxu1 %vm71_vm0, %v42_v12  ;;  %v56_v40 = vld [vmem:[%s1219_s0 + $0x150] sm:$0xff]  ;;  %v33_v41 = vld [vmem:[%s1219_s0 + $0x98] sm:$0xff]  ;;  %v34_v43 = vld [vmem:[%s1219_s0 + $0xa0] sm:$0xff] }
   0xf   :  { %v57_v42 = vld [vmem:[%s1219_s0 + $0x158] sm:$0xff]  ;;  %v58_v44 = vld [vmem:[%s1219_s0 + $0x160] sm:$0xff]  ;;  %v35_v45 = vld [vmem:[%s1219_s0 + $0xa8] sm:$0xff] }
  0x10   :  { %684 = vmatmul.mubr.msk.f32.gmra.mrb[4].mxu0 %vm71_vm0, %v19_v13  ;;  %v59_v46 = vld [vmem:[%s1219_s0 + $0x168] sm:$0xff]  ;;  %v36_v47 = vld [vmem:[%s1219_s0 + $0xb0] sm:$0xff]  ;;  %v37_v49 = vld [vmem:[%s1219_s0 + $0xb8] sm:$0xff] }
  0x11   :  { %720 = vmatmul.mubr.msk.f32.gmra.mrb[4].mxu1 %vm71_vm0, %v43_v14  ;;  %686 = vmatprep.mubr.msk.f32.mxu0 %vm71_vm0, %v20_v15  ;;  %v60_v48 = vld [vmem:[%s1219_s0 + $0x170] sm:$0xff]  ;;  %v61_v50 = vld [vmem:[%s1219_s0 + $0x178] sm:$0xff]  ;;  %v976_v51 = vld [vmem:[%s1220_s2] ss:$0 sm:$0xff] }
  0x12   :  { %722 = vmatprep.mubr.msk.f32.mxu1 %vm71_vm0, %v44_v16 }
  0x14   :  { %687 = vmatmul.mubr.msk.f32.gmra.mrb[6].mxu0 %vm71_vm0, %v21_v17 }
  0x15   :  { %723 = vmatmul.mubr.msk.f32.gmra.mrb[6].mxu1 %vm71_vm0, %v45_v18  ;;  %689 = vmatprep.mubr.msk.f32.mxu0 %vm71_vm0, %v22_v19 }
  0x16   :  { %725 = vmatprep.mubr.msk.f32.mxu1 %vm71_vm0, %v46_v20 }
  0x18   :  { %690 = vmatmul.mubr.msk.f32.gmra.mrb[8].mxu0 %vm71_vm0, %v23_v21 }
  0x19   :  { %726 = vmatmul.mubr.msk.f32.gmra.mrb[8].mxu1 %vm71_vm0, %v47_v22  ;;  %692 = vmatprep.mubr.msk.f32.mxu0 %vm71_vm0, %v24_v23 }
  0x1a   :  { %728 = vmatprep.mubr.msk.f32.mxu1 %vm71_vm0, %v48_v24 }
  0x1c   :  { %693 = vmatmul.mubr.msk.f32.gmra.mrb[10].mxu0 %vm71_vm0, %v25_v25 }
  0x1d   :  { %729 = vmatmul.mubr.msk.f32.gmra.mrb[10].mxu1 %vm71_vm0, %v49_v26  ;;  %695 = vmatprep.mubr.msk.f32.mxu0 %vm71_vm0, %v26_v27 }
  0x1e   :  { %731 = vmatprep.mubr.msk.f32.mxu1 %vm71_vm0, %v50_v28 }
  0x20   :  { %696 = vmatmul.mubr.msk.f32.gmra.mrb[12].mxu0 %vm71_vm0, %v27_v29 }
  0x21   :  { %732 = vmatmul.mubr.msk.f32.gmra.mrb[12].mxu1 %vm71_vm0, %v51_v30  ;;  %698 = vmatprep.mubr.msk.f32.mxu0 %vm71_vm0, %v28_v31 }
  0x22   :  { %734 = vmatprep.mubr.msk.f32.mxu1 %vm71_vm0, %v52_v32 }
  0x24   :  { %699 = vmatmul.mubr.msk.f32.gmra.mrb[14].mxu0 %vm71_vm0, %v29_v33 }
  0x25   :  { %735 = vmatmul.mubr.msk.f32.gmra.mrb[14].mxu1 %vm71_vm0, %v53_v34  ;;  %701 = vmatprep.mubr.msk.f32.mxu0 %vm71_vm0, %v30_v35 }
  0x26   :  { %737 = vmatprep.mubr.msk.f32.mxu1 %vm71_vm0, %v54_v36 }
  0x28   :  { %702 = vmatmul.mubr.msk.f32.gmra.mrb[16].mxu0 %vm71_vm0, %v31_v37 }
  0x29   :  { %738 = vmatmul.mubr.msk.f32.gmra.mrb[16].mxu1 %vm71_vm0, %v55_v38  ;;  %704 = vmatprep.mubr.msk.f32.mxu0 %vm71_vm0, %v32_v39 }
  0x2a   :  { %740 = vmatprep.mubr.msk.f32.mxu1 %vm71_vm0, %v56_v40 }
  0x2c   :  { %705 = vmatmul.mubr.msk.f32.gmra.mrb[18].mxu0 %vm71_vm0, %v33_v41 }
  0x2d   :  { %741 = vmatmul.mubr.msk.f32.gmra.mrb[18].mxu1 %vm71_vm0, %v57_v42  ;;  %707 = vmatprep.mubr.msk.f32.mxu0 %vm71_vm0, %v34_v43 }
  0x2e   :  { %743 = vmatprep.mubr.msk.f32.mxu1 %vm71_vm0, %v58_v44 }
  0x30   :  { %708 = vmatmul.mubr.msk.f32.gmra.mrb[20].mxu0 %vm71_vm0, %v35_v45 }
  0x31   :  { %744 = vmatmul.mubr.msk.f32.gmra.mrb[20].mxu1 %vm71_vm0, %v59_v46  ;;  %710 = vmatprep.mubr.msk.f32.mxu0 %vm71_vm0, %v36_v47 }
  0x32   :  { %746 = vmatprep.mubr.msk.f32.mxu1 %vm71_vm0, %v60_v48 }
  0x34   :  { %711 = vmatmul.mubr.msk.f32.gmra.mrb[22].mxu0 %vm71_vm0, %v37_v49 }
  0x35   :  { %747 = vmatmul.mubr.msk.f32.gmra.mrb[22].mxu1 %vm71_vm0, %v61_v50 }
  0xdb   :  { %v679_v52 = vpop.f32.mrb[0].mxu0 }
  0xdc   :  { %v715_v53 = vpop.f32.mrb[0].mxu1  ;;  %v288_v54 = vadd.f32 %v679_v52, %v976_v51  ;;  %v282_v56 = vpop.f32.mrb[1].mxu0 }
  0xdd   :  { %v408_v55 = vadd.f32 %v715_v53, %v976_v51  ;;  %v402_v57 = vpop.f32.mrb[1].mxu1  ;;  %v283_v58 = vadd.f32 %v976_v51, %v282_v56 }
  0xde   :  { %v403_v59 = vadd.f32 %v976_v51, %v402_v57  ;;  %523 = vst.msk [vmem:[%s1221_s3 + $0x8] sm:$0xff] %vm521_vm1, %v288_v54 }
  0xdf   :  { %547 = vst.msk [vmem:[%s1221_s3 + $0xc8] sm:$0xff] %vm521_vm1, %v408_v55  ;;  %522 = vst.msk [vmem:[%s1221_s3] sm:$0xff] %vm521_vm1, %v283_v58  ;;  %v682_v60 = vpop.f32.mrb[2].mxu0 }
  0xe0   :  { %546 = vst.msk [vmem:[%s1221_s3 + $0xc0] sm:$0xff] %vm521_vm1, %v403_v59  ;;  %v718_v61 = vpop.f32.mrb[2].mxu1  ;;  %v298_v62 = vadd.f32 %v682_v60, %v976_v51  ;;  %v292_v0 = vpop.f32.mrb[3].mxu0 }
  0xe1   :  { %v418_v63 = vadd.f32 %v718_v61, %v976_v51  ;;  %v412_v1 = vpop.f32.mrb[3].mxu1  ;;  %v293_v2 = vadd.f32 %v976_v51, %v292_v0 }
  0xe2   :  { %v413_v3 = vadd.f32 %v976_v51, %v412_v1  ;;  %525 = vst.msk [vmem:[%s1221_s3 + $0x18] sm:$0xff] %vm521_vm1, %v298_v62 }
  0xe3   :  { %549 = vst.msk [vmem:[%s1221_s3 + $0xd8] sm:$0xff] %vm521_vm1, %v418_v63  ;;  %524 = vst.msk [vmem:[%s1221_s3 + $0x10] sm:$0xff] %vm521_vm1, %v293_v2  ;;  %v685_v4 = vpop.f32.mrb[4].mxu0 }
  0xe4   :  { %548 = vst.msk [vmem:[%s1221_s3 + $0xd0] sm:$0xff] %vm521_vm1, %v413_v3  ;;  %v721_v5 = vpop.f32.mrb[4].mxu1  ;;  %v308_v6 = vadd.f32 %v685_v4, %v976_v51  ;;  %v302_v8 = vpop.f32.mrb[5].mxu0 }
  0xe5   :  { %v428_v7 = vadd.f32 %v721_v5, %v976_v51  ;;  %v422_v9 = vpop.f32.mrb[5].mxu1  ;;  %v303_v10 = vadd.f32 %v976_v51, %v302_v8 }
  0xe6   :  { %v423_v11 = vadd.f32 %v976_v51, %v422_v9  ;;  %527 = vst.msk [vmem:[%s1221_s3 + $0x28] sm:$0xff] %vm521_vm1, %v308_v6 }
  0xe7   :  { %551 = vst.msk [vmem:[%s1221_s3 + $0xe8] sm:$0xff] %vm521_vm1, %v428_v7  ;;  %526 = vst.msk [vmem:[%s1221_s3 + $0x20] sm:$0xff] %vm521_vm1, %v303_v10  ;;  %v688_v12 = vpop.f32.mrb[6].mxu0 }
  0xe8   :  { %550 = vst.msk [vmem:[%s1221_s3 + $0xe0] sm:$0xff] %vm521_vm1, %v423_v11  ;;  %v724_v13 = vpop.f32.mrb[6].mxu1  ;;  %v318_v14 = vadd.f32 %v688_v12, %v976_v51  ;;  %v312_v16 = vpop.f32.mrb[7].mxu0 }
  0xe9   :  { %v438_v15 = vadd.f32 %v724_v13, %v976_v51  ;;  %v432_v17 = vpop.f32.mrb[7].mxu1  ;;  %v313_v18 = vadd.f32 %v976_v51, %v312_v16 }
  0xea   :  { %v433_v19 = vadd.f32 %v976_v51, %v432_v17  ;;  %529 = vst.msk [vmem:[%s1221_s3 + $0x38] sm:$0xff] %vm521_vm1, %v318_v14 }
  0xeb   :  { %553 = vst.msk [vmem:[%s1221_s3 + $0xf8] sm:$0xff] %vm521_vm1, %v438_v15  ;;  %528 = vst.msk [vmem:[%s1221_s3 + $0x30] sm:$0xff] %vm521_vm1, %v313_v18  ;;  %v691_v20 = vpop.f32.mrb[8].mxu0 }
  0xec   :  { %552 = vst.msk [vmem:[%s1221_s3 + $0xf0] sm:$0xff] %vm521_vm1, %v433_v19  ;;  %v727_v21 = vpop.f32.mrb[8].mxu1  ;;  %v328_v22 = vadd.f32 %v691_v20, %v976_v51  ;;  %v322_v24 = vpop.f32.mrb[9].mxu0 }
  0xed   :  { %v448_v23 = vadd.f32 %v727_v21, %v976_v51  ;;  %v442_v25 = vpop.f32.mrb[9].mxu1  ;;  %v323_v26 = vadd.f32 %v976_v51, %v322_v24 }
  0xee   :  { %v443_v27 = vadd.f32 %v976_v51, %v442_v25  ;;  %531 = vst.msk [vmem:[%s1221_s3 + $0x48] sm:$0xff] %vm521_vm1, %v328_v22 }
  0xef   :  { %555 = vst.msk [vmem:[%s1221_s3 + $0x108] sm:$0xff] %vm521_vm1, %v448_v23  ;;  %530 = vst.msk [vmem:[%s1221_s3 + $0x40] sm:$0xff] %vm521_vm1, %v323_v26  ;;  %v694_v28 = vpop.f32.mrb[10].mxu0 }
  0xf0   :  { %554 = vst.msk [vmem:[%s1221_s3 + $0x100] sm:$0xff] %vm521_vm1, %v443_v27  ;;  %v730_v29 = vpop.f32.mrb[10].mxu1  ;;  %v338_v30 = vadd.f32 %v694_v28, %v976_v51  ;;  %v332_v32 = vpop.f32.mrb[11].mxu0 }
  0xf1   :  { %v458_v31 = vadd.f32 %v730_v29, %v976_v51  ;;  %v452_v33 = vpop.f32.mrb[11].mxu1  ;;  %v333_v34 = vadd.f32 %v976_v51, %v332_v32 }
  0xf2   :  { %v453_v35 = vadd.f32 %v976_v51, %v452_v33  ;;  %533 = vst.msk [vmem:[%s1221_s3 + $0x58] sm:$0xff] %vm521_vm1, %v338_v30 }
  0xf3   :  { %557 = vst.msk [vmem:[%s1221_s3 + $0x118] sm:$0xff] %vm521_vm1, %v458_v31  ;;  %532 = vst.msk [vmem:[%s1221_s3 + $0x50] sm:$0xff] %vm521_vm1, %v333_v34  ;;  %v697_v36 = vpop.f32.mrb[12].mxu0 }
  0xf4   :  { %556 = vst.msk [vmem:[%s1221_s3 + $0x110] sm:$0xff] %vm521_vm1, %v453_v35  ;;  %v733_v37 = vpop.f32.mrb[12].mxu1  ;;  %v348_v38 = vadd.f32 %v697_v36, %v976_v51  ;;  %v342_v40 = vpop.f32.mrb[13].mxu0 }
  0xf5   :  { %v468_v39 = vadd.f32 %v733_v37, %v976_v51  ;;  %v462_v41 = vpop.f32.mrb[13].mxu1  ;;  %v343_v42 = vadd.f32 %v976_v51, %v342_v40 }
  0xf6   :  { %v463_v43 = vadd.f32 %v976_v51, %v462_v41  ;;  %535 = vst.msk [vmem:[%s1221_s3 + $0x68] sm:$0xff] %vm521_vm1, %v348_v38 }
  0xf7   :  { %559 = vst.msk [vmem:[%s1221_s3 + $0x128] sm:$0xff] %vm521_vm1, %v468_v39  ;;  %534 = vst.msk [vmem:[%s1221_s3 + $0x60] sm:$0xff] %vm521_vm1, %v343_v42  ;;  %v700_v44 = vpop.f32.mrb[14].mxu0 }
  0xf8   :  { %558 = vst.msk [vmem:[%s1221_s3 + $0x120] sm:$0xff] %vm521_vm1, %v463_v43  ;;  %v736_v45 = vpop.f32.mrb[14].mxu1  ;;  %v358_v46 = vadd.f32 %v700_v44, %v976_v51  ;;  %v352_v48 = vpop.f32.mrb[15].mxu0 }
  0xf9   :  { %v478_v47 = vadd.f32 %v736_v45, %v976_v51  ;;  %v472_v49 = vpop.f32.mrb[15].mxu1  ;;  %v353_v50 = vadd.f32 %v976_v51, %v352_v48 }
  0xfa   :  { %v473_v52 = vadd.f32 %v976_v51, %v472_v49  ;;  %537 = vst.msk [vmem:[%s1221_s3 + $0x78] sm:$0xff] %vm521_vm1, %v358_v46 }
  0xfb   :  { %561 = vst.msk [vmem:[%s1221_s3 + $0x138] sm:$0xff] %vm521_vm1, %v478_v47  ;;  %536 = vst.msk [vmem:[%s1221_s3 + $0x70] sm:$0xff] %vm521_vm1, %v353_v50  ;;  %v703_v53 = vpop.f32.mrb[16].mxu0 }
  0xfc   :  { %560 = vst.msk [vmem:[%s1221_s3 + $0x130] sm:$0xff] %vm521_vm1, %v473_v52  ;;  %v739_v54 = vpop.f32.mrb[16].mxu1  ;;  %v368_v55 = vadd.f32 %v703_v53, %v976_v51  ;;  %v362_v57 = vpop.f32.mrb[17].mxu0 }
  0xfd   :  { %v488_v56 = vadd.f32 %v739_v54, %v976_v51  ;;  %v482_v58 = vpop.f32.mrb[17].mxu1  ;;  %v363_v59 = vadd.f32 %v976_v51, %v362_v57 }
  0xfe   :  { %v483_v60 = vadd.f32 %v976_v51, %v482_v58  ;;  %539 = vst.msk [vmem:[%s1221_s3 + $0x88] sm:$0xff] %vm521_vm1, %v368_v55 }
  0xff   :  { %563 = vst.msk [vmem:[%s1221_s3 + $0x148] sm:$0xff] %vm521_vm1, %v488_v56  ;;  %538 = vst.msk [vmem:[%s1221_s3 + $0x80] sm:$0xff] %vm521_vm1, %v363_v59  ;;  %v706_v61 = vpop.f32.mrb[18].mxu0 }
 0x100   :  { %562 = vst.msk [vmem:[%s1221_s3 + $0x140] sm:$0xff] %vm521_vm1, %v483_v60  ;;  %v742_v62 = vpop.f32.mrb[18].mxu1  ;;  %v378_v63 = vadd.f32 %v706_v61, %v976_v51  ;;  %v372_v1 = vpop.f32.mrb[19].mxu0 }
 0x101   :  { %v498_v0 = vadd.f32 %v742_v62, %v976_v51  ;;  %v492_v2 = vpop.f32.mrb[19].mxu1  ;;  %v373_v3 = vadd.f32 %v976_v51, %v372_v1 }
 0x102   :  { %v493_v4 = vadd.f32 %v976_v51, %v492_v2  ;;  %541 = vst.msk [vmem:[%s1221_s3 + $0x98] sm:$0xff] %vm521_vm1, %v378_v63 }
 0x103   :  { %565 = vst.msk [vmem:[%s1221_s3 + $0x158] sm:$0xff] %vm521_vm1, %v498_v0  ;;  %540 = vst.msk [vmem:[%s1221_s3 + $0x90] sm:$0xff] %vm521_vm1, %v373_v3  ;;  %v709_v5 = vpop.f32.mrb[20].mxu0 }
 0x104   :  { %564 = vst.msk [vmem:[%s1221_s3 + $0x150] sm:$0xff] %vm521_vm1, %v493_v4  ;;  %v745_v6 = vpop.f32.mrb[20].mxu1  ;;  %v388_v7 = vadd.f32 %v709_v5, %v976_v51  ;;  %v382_v9 = vpop.f32.mrb[21].mxu0 }
 0x105   :  { %v508_v8 = vadd.f32 %v745_v6, %v976_v51  ;;  %v502_v10 = vpop.f32.mrb[21].mxu1  ;;  %v383_v11 = vadd.f32 %v976_v51, %v382_v9 }
 0x106   :  { %v503_v12 = vadd.f32 %v976_v51, %v502_v10  ;;  %543 = vst.msk [vmem:[%s1221_s3 + $0xa8] sm:$0xff] %vm521_vm1, %v388_v7 }
 0x107   :  { %567 = vst.msk [vmem:[%s1221_s3 + $0x168] sm:$0xff] %vm521_vm1, %v508_v8  ;;  %542 = vst.msk [vmem:[%s1221_s3 + $0xa0] sm:$0xff] %vm521_vm1, %v383_v11  ;;  %v712_v13 = vpop.f32.mrb[22].mxu0 }
 0x108   :  { %566 = vst.msk [vmem:[%s1221_s3 + $0x160] sm:$0xff] %vm521_vm1, %v503_v12  ;;  %v748_v14 = vpop.f32.mrb[22].mxu1  ;;  %v398_v15 = vadd.f32 %v712_v13, %v976_v51  ;;  %v392_v17 = vpop.f32.mrb[23].mxu0 }
 0x109   :  { %v518_v16 = vadd.f32 %v748_v14, %v976_v51  ;;  %v512_v18 = vpop.f32.mrb[23].mxu1  ;;  %v393_v19 = vadd.f32 %v976_v51, %v392_v17 }
 0x10a   :  { %v513_v20 = vadd.f32 %v976_v51, %v512_v18  ;;  %545 = vst.msk [vmem:[%s1221_s3 + $0xb8] sm:$0xff] %vm521_vm1, %v398_v15 }
 0x10b   :  { %569 = vst.msk [vmem:[%s1221_s3 + $0x178] sm:$0xff] %vm521_vm1, %v518_v16  ;;  %544 = vst.msk [vmem:[%s1221_s3 + $0xb0] sm:$0xff] %vm521_vm1, %v393_v19 }
 0x10c   :  { %568 = vst.msk [vmem:[%s1221_s3 + $0x170] sm:$0xff] %vm521_vm1, %v513_v20 }

</bundles_post_ra>
